<compile_context>
chip_gen: v7x
topology: tpu7x:2x2x1
jax: 0.10.0
libtpu: 0.0.40
codegen_flags: <defaults>
</compile_context>

<pallas_src>
import functools

import jax
import jax.numpy as jnp
from jax.experimental import pallas as pl
from jax.experimental.pallas import tpu as pltpu


# ----------------------------------------------------------------------------
# Fused Pallas kernel: dw3x3+BN+ReLU -> pw1x1+BN+ReLU, twice, all in VMEM.
# ----------------------------------------------------------------------------
def _lsfe_fused_kernel(x_ref,
                       wd1_ref, bd1_ref, wp1_ref, bp1_ref,
                       wd2_ref, bd2_ref, wp2_ref, bp2_ref,
                       o_ref, *, H, W, C_in, C_mid):
    """One batch element per grid step.

    x_ref : (1, H, W*C_in)        lane-packed activations (lane = w*C + c)
    wd*   : (3, 3, W*C)           depthwise weights, BN-scale folded, tiled to lanes
    bd*   : (1, W*C)              depthwise folded-BN bias, tiled to lanes
    wp*   : (W*C_in, W*C_out)     block-diagonal 1x1 weights, BN-scale folded
    bp*   : (1, W*C_out)          pointwise folded-BN bias, tiled to lanes
    o_ref : (1, H, W*C_out)
    """

    def dw3x3_bn_relu(y2d, wd_ref, bd_ref, C):
        # y2d: (H, W*C) float32, channel-packed lanes.
        WC = W * C
        # Build the 1-pixel zero halo in VMEM (never touches HBM).
        zrow = jnp.zeros((1, WC), jnp.float32)
        zcol = jnp.zeros((H + 2, C), jnp.float32)
        yp = jnp.concatenate([zrow, y2d, zrow], axis=0)      # (H+2, WC)
        yp = jnp.concatenate([zcol, yp, zcol], axis=1)       # (H+2, WC + 2C)
        wd = wd_ref[...]                                     # (3, 3, WC)
        # Start the accumulator from the folded-BN bias (saves one VPU add).
        acc = jnp.broadcast_to(bd_ref[...], (H, WC)).astype(jnp.float32)
        # 9 shifted full-tile multiply-adds; a dx-pixel shift in W is a dx*C
        # lane shift in the packed layout (XLU lane rotate, off the VALU).
        for ky in range(3):
            for kx in range(3):
                tap = yp[ky:ky + H, kx * C:kx * C + WC]
                acc = acc + tap * wd[ky, kx]
        return jnp.maximum(acc, 0.0)

    def pw1x1_bn_relu(y2d, wp_ref, bp_ref):
        # 1x1 conv in packed layout: block-diagonal matmul on the MXU.
        z = jnp.dot(y2d, wp_ref[...], preferred_element_type=jnp.float32)
        return jnp.maximum(z + bp_ref[...], 0.0)

    y = x_ref[0].astype(jnp.float32)                   # (H, W*C_in)
    y = dw3x3_bn_relu(y, wd1_ref, bd1_ref, C_in)       # (H, W*C_in)
    y = pw1x1_bn_relu(y, wp1_ref, bp1_ref)             # (H, W*C_mid)
    y = dw3x3_bn_relu(y, wd2_ref, bd2_ref, C_mid)      # (H, W*C_mid)
    y = pw1x1_bn_relu(y, wp2_ref, bp2_ref)             # (H, W*C_out)
    o_ref[0] = y.astype(o_ref.dtype)


# ----------------------------------------------------------------------------
# One-time weight preparation: fold eval-mode BN, pack into lane layout.
# ----------------------------------------------------------------------------
def _fold_bn(gamma, beta, mean, var, eps=1e-5):
    scale = gamma / jnp.sqrt(var + eps)
    bias = beta - mean * scale
    return scale, bias


def _pack_module_params(p, W):
    c_in = p["w_dw"].shape[-1]
    c_out = p["w_pw"].shape[-1]
    s_dw, b_dw = _fold_bn(*p["dw_bn"])
    s_pw, b_pw = _fold_bn(*p["pw_bn"])

    wd = p["w_dw"] * s_dw                              # (3, 3, c_in), scale folded
    wd_lane = jnp.tile(wd, (1, 1, W))                  # (3, 3, W*c_in), lane = w*c + c
    bd_lane = jnp.tile(b_dw, (W,)).reshape(1, W * c_in)

    wp = p["w_pw"] * s_pw[None, :]                     # (c_in, c_out), scale folded
    wp_blk = jnp.kron(jnp.eye(W, dtype=wp.dtype), wp)  # (W*c_in, W*c_out) block-diag
    bp_lane = jnp.tile(b_pw, (W,)).reshape(1, W * c_out)
    return wd_lane, bd_lane, wp_blk, bp_lane


def pack_lsfe_params(params_list, W):
    """Fold eval-mode BN into conv weights and pack into the (H, W*C) lane
    layout.  Run ONCE per weight set, off the forward hot path."""
    assert len(params_list) == 2
    return (_pack_module_params(params_list[0], W)
            + _pack_module_params(params_list[1], W))


# ----------------------------------------------------------------------------
# Jitted forward: one pallas_call over the batch.
# ----------------------------------------------------------------------------
@jax.jit
def lsfe_forward(x, packed):
    """LSFE.forward on NHWC input: two stacked DS conv modules, fused."""
    wd1, bd1, wp1, bp1, wd2, bd2, wp2, bp2 = packed
    N, H, W, C_in = x.shape
    C_mid = wp1.shape[1] // W
    C_out = wp2.shape[1] // W

    x2d = x.reshape(N, H, W * C_in)                    # free, contiguous reshape

    kernel = functools.partial(_lsfe_fused_kernel, H=H, W=W, C_in=C_in, C_mid=C_mid)
    const2 = lambda n: (0, 0)
    const3 = lambda n: (0, 0, 0)

    out2d = pl.pallas_call(
        kernel,
        out_shape=jax.ShapeDtypeStruct((N, H, W * C_out), x.dtype),
        grid_spec=pltpu.PrefetchScalarGridSpec(
            num_scalar_prefetch=0,
            grid=(N,),
            in_specs=[
                pl.BlockSpec((1, H, W * C_in), lambda n: (n, 0, 0)),
                pl.BlockSpec((3, 3, W * C_in), const3),
                pl.BlockSpec((1, W * C_in), const2),
                pl.BlockSpec((W * C_in, W * C_mid), const2),
                pl.BlockSpec((1, W * C_mid), const2),
                pl.BlockSpec((3, 3, W * C_mid), const3),
                pl.BlockSpec((1, W * C_mid), const2),
                pl.BlockSpec((W * C_mid, W * C_out), const2),
                pl.BlockSpec((1, W * C_out), const2),
            ],
            out_specs=pl.BlockSpec((1, H, W * C_out), lambda n: (n, 0, 0)),
        ),
        compiler_params=pltpu.CompilerParams(
            dimension_semantics=("parallel",),
            vmem_limit_bytes=32 * 1024 * 1024,
        ),
    )(x2d, wd1, bd1, wp1, bp1, wd2, bd2, wp2, bp2)

    return out2d.reshape(N, H, W, C_out)


# ----------------------------------------------------------------------------
# Parameter construction (deterministic, synthetic)
# ----------------------------------------------------------------------------
def make_ds_params(key, c_in, c_out):
    k = jax.random.split(key, 8)
    w_dw = 0.1 * jax.random.normal(k[0], (3, 3, c_in), jnp.float32)
    w_pw = 0.1 * jax.random.normal(k[1], (c_in, c_out), jnp.float32)
    dw_bn = (
        1.0 + 0.05 * jax.random.normal(k[2], (c_in,), jnp.float32),          # gamma
        0.05 * jax.random.normal(k[3], (c_in,), jnp.float32),                # beta
        0.05 * jax.random.normal(k[4], (c_in,), jnp.float32),                # running_mean
        jnp.abs(1.0 + 0.05 * jax.random.normal(k[5], (c_in,), jnp.float32)), # running_var
    )
    pw_bn = (
        1.0 + 0.05 * jax.random.normal(k[6], (c_out,), jnp.float32),
        0.05 * jax.random.normal(k[7], (c_out,), jnp.float32),
        jnp.zeros((c_out,), jnp.float32),
        jnp.ones((c_out,), jnp.float32),
    )
    return {"w_dw": w_dw, "w_pw": w_pw, "dw_bn": dw_bn, "pw_bn": pw_bn}


# ----------------------------------------------------------------------------
# Plain-JAX reference (correctness check)
# ----------------------------------------------------------------------------
def _ref_ds(x, params):
    s_dw, b_dw = _fold_bn(*params["dw_bn"])
    s_pw, b_pw = _fold_bn(*params["pw_bn"])
    C = x.shape[-1]
    w_dw = params["w_dw"].reshape(3, 3, 1, C)
    y = jax.lax.conv_general_dilated(
        x, w_dw, window_strides=(1, 1), padding="SAME",
        dimension_numbers=("NHWC", "HWIO", "NHWC"), feature_group_count=C)
    y = jnp.maximum(y * s_dw + b_dw, 0.0)
    y = jnp.maximum(jnp.einsum("nhwc,cd->nhwd", y, params["w_pw"]) * s_pw + b_pw, 0.0)
    return y


def _ref_lsfe(x, params_list):
    for p in params_list:
        x = _ref_ds(x, p)
    return x


# ----------------------------------------------------------------------------
if __name__ == "__main__":
    key = jax.random.PRNGKey(0)
    k_x, k_p1, k_p2 = jax.random.split(key, 3)

    N, H, W = 2, 16, 16
    in_channels, out_channels = 4, 8

    # NHWC input (equivalent to a (2, 4, 16, 16) NCHW PyTorch input, transposed).
    x = jax.random.normal(k_x, (N, H, W, in_channels), jnp.float32)

    params = [
        make_ds_params(k_p1, in_channels, out_channels),
        make_ds_params(k_p2, out_channels, out_channels),
    ]

    packed = pack_lsfe_params(params, W)               # one-time weight prep
    out = jax.block_until_ready(lsfe_forward(x, packed))
    ref = _ref_lsfe(x, params)

    assert out.shape == (N, H, W, out_channels)
    assert jnp.allclose(out, ref, atol=1e-4, rtol=1e-4), "mismatch vs. JAX reference"

    print("KERNEL_OK")
</pallas_src>

<mosaic_0001>
module attributes {stable_mosaic.version = 11 : i64} {
  func.func @_lsfe_fused_kernel(%arg0: i32, %arg1: memref<1x16x64xf32, #tpu.memory_space<vmem>>, %arg2: memref<3x3x64xf32, #tpu.memory_space<vmem>>, %arg3: memref<1x64xf32, #tpu.memory_space<vmem>>, %arg4: memref<64x128xf32, #tpu.memory_space<vmem>>, %arg5: memref<1x128xf32, #tpu.memory_space<vmem>>, %arg6: memref<3x3x128xf32, #tpu.memory_space<vmem>>, %arg7: memref<1x128xf32, #tpu.memory_space<vmem>>, %arg8: memref<128x128xf32, #tpu.memory_space<vmem>>, %arg9: memref<1x128xf32, #tpu.memory_space<vmem>>, %arg10: memref<1x16x128xf32, #tpu.memory_space<vmem>>) attributes {dimension_semantics = [#tpu.dimension_semantics<parallel>], iteration_bounds = array<i64: 2>, scalar_prefetch = 0 : i64, scratch_operands = 0 : i64, tpu.core_type = #tpu.core_type<tc>, window_params = [{transform_indices = @transform_0, window_bounds = array<i64: 1, 16, 64>}, {pipeline_mode = #tpu.pipeline_mode<synchronous>, transform_indices = @transform_1, window_bounds = array<i64: 3, 3, 64>}, {pipeline_mode = #tpu.pipeline_mode<synchronous>, transform_indices = @transform_2, window_bounds = array<i64: 1, 64>}, {pipeline_mode = #tpu.pipeline_mode<synchronous>, transform_indices = @transform_3, window_bounds = array<i64: 64, 128>}, {pipeline_mode = #tpu.pipeline_mode<synchronous>, transform_indices = @transform_4, window_bounds = array<i64: 1, 128>}, {pipeline_mode = #tpu.pipeline_mode<synchronous>, transform_indices = @transform_5, window_bounds = array<i64: 3, 3, 128>}, {pipeline_mode = #tpu.pipeline_mode<synchronous>, transform_indices = @transform_6, window_bounds = array<i64: 1, 128>}, {pipeline_mode = #tpu.pipeline_mode<synchronous>, transform_indices = @transform_7, window_bounds = array<i64: 128, 128>}, {pipeline_mode = #tpu.pipeline_mode<synchronous>, transform_indices = @transform_8, window_bounds = array<i64: 1, 128>}, {transform_indices = @transform_9, window_bounds = array<i64: 1, 16, 128>}]} {
    %c0 = arith.constant 0 : index
    %c0_0 = arith.constant 0 : index
    %c0_1 = arith.constant 0 : index
    %0 = vector.load %arg1[%c0, %c0_0, %c0_1] : memref<1x16x64xf32, #tpu.memory_space<vmem>>, vector<1x16x64xf32>
    %1 = vector.shape_cast %0 : vector<1x16x64xf32> to vector<16x64xf32>
    %cst = arith.constant 0.000000e+00 : f32
    %2 = vector.broadcast %cst : f32 to vector<1x64xf32>
    %cst_2 = arith.constant 0.000000e+00 : f32
    %3 = vector.broadcast %cst_2 : f32 to vector<18x4xf32>
    %4 = tpu.concatenate %2, %1, %2 in 0 : vector<1x64xf32>, vector<16x64xf32>, vector<1x64xf32> -> vector<18x64xf32>
    %5 = tpu.concatenate %3, %4, %3 in 1 : vector<18x4xf32>, vector<18x64xf32>, vector<18x4xf32> -> vector<18x72xf32>
    %c0_3 = arith.constant 0 : index
    %c0_4 = arith.constant 0 : index
    %c0_5 = arith.constant 0 : index
    %6 = vector.load %arg2[%c0_3, %c0_4, %c0_5] : memref<3x3x64xf32, #tpu.memory_space<vmem>>, vector<3x3x64xf32>
    %c0_6 = arith.constant 0 : index
    %c0_7 = arith.constant 0 : index
    %7 = vector.load %arg3[%c0_6, %c0_7] : memref<1x64xf32, #tpu.memory_space<vmem>>, vector<1x64xf32>
    %8 = vector.shape_cast %7 : vector<1x64xf32> to vector<1x64xf32>
    %9 = vector.broadcast %8 : vector<1x64xf32> to vector<16x64xf32>
    %10 = vector.extract_strided_slice %5 {offsets = [0, 0], sizes = [16, 64], strides = [1, 1]} : vector<18x72xf32> to vector<16x64xf32>
    %11 = vector.extract_strided_slice %6 {offsets = [0, 0, 0], sizes = [1, 1, 64], strides = [1, 1, 1]} : vector<3x3x64xf32> to vector<1x1x64xf32>
    %12 = vector.shape_cast %11 : vector<1x1x64xf32> to vector<64xf32>
    %13 = vector.shape_cast %12 : vector<64xf32> to vector<1x64xf32>
    %14 = vector.broadcast %13 : vector<1x64xf32> to vector<16x64xf32>
    %15 = arith.mulf %10, %14 : vector<16x64xf32>
    %16 = arith.addf %9, %15 : vector<16x64xf32>
    %17 = vector.extract_strided_slice %5 {offsets = [0, 4], sizes = [16, 64], strides = [1, 1]} : vector<18x72xf32> to vector<16x64xf32>
    %18 = vector.extract_strided_slice %6 {offsets = [0, 1, 0], sizes = [1, 1, 64], strides = [1, 1, 1]} : vector<3x3x64xf32> to vector<1x1x64xf32>
    %19 = vector.shape_cast %18 : vector<1x1x64xf32> to vector<64xf32>
    %20 = vector.shape_cast %19 : vector<64xf32> to vector<1x64xf32>
    %21 = vector.broadcast %20 : vector<1x64xf32> to vector<16x64xf32>
    %22 = arith.mulf %17, %21 : vector<16x64xf32>
    %23 = arith.addf %16, %22 : vector<16x64xf32>
    %24 = vector.extract_strided_slice %5 {offsets = [0, 8], sizes = [16, 64], strides = [1, 1]} : vector<18x72xf32> to vector<16x64xf32>
    %25 = vector.extract_strided_slice %6 {offsets = [0, 2, 0], sizes = [1, 1, 64], strides = [1, 1, 1]} : vector<3x3x64xf32> to vector<1x1x64xf32>
    %26 = vector.shape_cast %25 : vector<1x1x64xf32> to vector<64xf32>
    %27 = vector.shape_cast %26 : vector<64xf32> to vector<1x64xf32>
    %28 = vector.broadcast %27 : vector<1x64xf32> to vector<16x64xf32>
    %29 = arith.mulf %24, %28 : vector<16x64xf32>
    %30 = arith.addf %23, %29 : vector<16x64xf32>
    %31 = vector.extract_strided_slice %5 {offsets = [1, 0], sizes = [16, 64], strides = [1, 1]} : vector<18x72xf32> to vector<16x64xf32>
    %32 = vector.extract_strided_slice %6 {offsets = [1, 0, 0], sizes = [1, 1, 64], strides = [1, 1, 1]} : vector<3x3x64xf32> to vector<1x1x64xf32>
    %33 = vector.shape_cast %32 : vector<1x1x64xf32> to vector<64xf32>
    %34 = vector.shape_cast %33 : vector<64xf32> to vector<1x64xf32>
    %35 = vector.broadcast %34 : vector<1x64xf32> to vector<16x64xf32>
    %36 = arith.mulf %31, %35 : vector<16x64xf32>
    %37 = arith.addf %30, %36 : vector<16x64xf32>
    %38 = vector.extract_strided_slice %5 {offsets = [1, 4], sizes = [16, 64], strides = [1, 1]} : vector<18x72xf32> to vector<16x64xf32>
    %39 = vector.extract_strided_slice %6 {offsets = [1, 1, 0], sizes = [1, 1, 64], strides = [1, 1, 1]} : vector<3x3x64xf32> to vector<1x1x64xf32>
    %40 = vector.shape_cast %39 : vector<1x1x64xf32> to vector<64xf32>
    %41 = vector.shape_cast %40 : vector<64xf32> to vector<1x64xf32>
    %42 = vector.broadcast %41 : vector<1x64xf32> to vector<16x64xf32>
    %43 = arith.mulf %38, %42 : vector<16x64xf32>
    %44 = arith.addf %37, %43 : vector<16x64xf32>
    %45 = vector.extract_strided_slice %5 {offsets = [1, 8], sizes = [16, 64], strides = [1, 1]} : vector<18x72xf32> to vector<16x64xf32>
    %46 = vector.extract_strided_slice %6 {offsets = [1, 2, 0], sizes = [1, 1, 64], strides = [1, 1, 1]} : vector<3x3x64xf32> to vector<1x1x64xf32>
    %47 = vector.shape_cast %46 : vector<1x1x64xf32> to vector<64xf32>
    %48 = vector.shape_cast %47 : vector<64xf32> to vector<1x64xf32>
    %49 = vector.broadcast %48 : vector<1x64xf32> to vector<16x64xf32>
    %50 = arith.mulf %45, %49 : vector<16x64xf32>
    %51 = arith.addf %44, %50 : vector<16x64xf32>
    %52 = vector.extract_strided_slice %5 {offsets = [2, 0], sizes = [16, 64], strides = [1, 1]} : vector<18x72xf32> to vector<16x64xf32>
    %53 = vector.extract_strided_slice %6 {offsets = [2, 0, 0], sizes = [1, 1, 64], strides = [1, 1, 1]} : vector<3x3x64xf32> to vector<1x1x64xf32>
    %54 = vector.shape_cast %53 : vector<1x1x64xf32> to vector<64xf32>
    %55 = vector.shape_cast %54 : vector<64xf32> to vector<1x64xf32>
    %56 = vector.broadcast %55 : vector<1x64xf32> to vector<16x64xf32>
    %57 = arith.mulf %52, %56 : vector<16x64xf32>
    %58 = arith.addf %51, %57 : vector<16x64xf32>
    %59 = vector.extract_strided_slice %5 {offsets = [2, 4], sizes = [16, 64], strides = [1, 1]} : vector<18x72xf32> to vector<16x64xf32>
    %60 = vector.extract_strided_slice %6 {offsets = [2, 1, 0], sizes = [1, 1, 64], strides = [1, 1, 1]} : vector<3x3x64xf32> to vector<1x1x64xf32>
    %61 = vector.shape_cast %60 : vector<1x1x64xf32> to vector<64xf32>
    %62 = vector.shape_cast %61 : vector<64xf32> to vector<1x64xf32>
    %63 = vector.broadcast %62 : vector<1x64xf32> to vector<16x64xf32>
    %64 = arith.mulf %59, %63 : vector<16x64xf32>
    %65 = arith.addf %58, %64 : vector<16x64xf32>
    %66 = vector.extract_strided_slice %5 {offsets = [2, 8], sizes = [16, 64], strides = [1, 1]} : vector<18x72xf32> to vector<16x64xf32>
    %67 = vector.extract_strided_slice %6 {offsets = [2, 2, 0], sizes = [1, 1, 64], strides = [1, 1, 1]} : vector<3x3x64xf32> to vector<1x1x64xf32>
    %68 = vector.shape_cast %67 : vector<1x1x64xf32> to vector<64xf32>
    %69 = vector.shape_cast %68 : vector<64xf32> to vector<1x64xf32>
    %70 = vector.broadcast %69 : vector<1x64xf32> to vector<16x64xf32>
    %71 = arith.mulf %66, %70 : vector<16x64xf32>
    %72 = arith.addf %65, %71 : vector<16x64xf32>
    %cst_8 = arith.constant 0.000000e+00 : f32
    %73 = vector.broadcast %cst_8 : f32 to vector<16x64xf32>
    %74 = arith.maximumf %72, %73 : vector<16x64xf32>
    %c0_9 = arith.constant 0 : index
    %c0_10 = arith.constant 0 : index
    %75 = vector.load %arg4[%c0_9, %c0_10] : memref<64x128xf32, #tpu.memory_space<vmem>>, vector<64x128xf32>
    %cst_11 = arith.constant dense<0.000000e+00> : vector<16x128xf32>
    %76 = tpu.matmul %74, %75, %cst_11 {dimension_numbers = #tpu.dot_dimension_numbers<[1], [0], [0], [1], [0, 0, 1, 1], [], []>} : vector<16x64xf32>, vector<64x128xf32>, vector<16x128xf32> -> vector<16x128xf32>
    %c0_12 = arith.constant 0 : index
    %c0_13 = arith.constant 0 : index
    %77 = vector.load %arg5[%c0_12, %c0_13] : memref<1x128xf32, #tpu.memory_space<vmem>>, vector<1x128xf32>
    %78 = vector.broadcast %77 : vector<1x128xf32> to vector<16x128xf32>
    %79 = arith.addf %76, %78 : vector<16x128xf32>
    %cst_14 = arith.constant 0.000000e+00 : f32
    %80 = vector.broadcast %cst_14 : f32 to vector<16x128xf32>
    %81 = arith.maximumf %79, %80 : vector<16x128xf32>
    %cst_15 = arith.constant 0.000000e+00 : f32
    %82 = vector.broadcast %cst_15 : f32 to vector<1x128xf32>
    %cst_16 = arith.constant 0.000000e+00 : f32
    %83 = vector.broadcast %cst_16 : f32 to vector<18x8xf32>
    %84 = tpu.concatenate %82, %81, %82 in 0 : vector<1x128xf32>, vector<16x128xf32>, vector<1x128xf32> -> vector<18x128xf32>
    %85 = tpu.concatenate %83, %84, %83 in 1 : vector<18x8xf32>, vector<18x128xf32>, vector<18x8xf32> -> vector<18x144xf32>
    %c0_17 = arith.constant 0 : index
    %c0_18 = arith.constant 0 : index
    %c0_19 = arith.constant 0 : index
    %86 = vector.load %arg6[%c0_17, %c0_18, %c0_19] : memref<3x3x128xf32, #tpu.memory_space<vmem>>, vector<3x3x128xf32>
    %c0_20 = arith.constant 0 : index
    %c0_21 = arith.constant 0 : index
    %87 = vector.load %arg7[%c0_20, %c0_21] : memref<1x128xf32, #tpu.memory_space<vmem>>, vector<1x128xf32>
    %88 = vector.shape_cast %87 : vector<1x128xf32> to vector<1x128xf32>
    %89 = vector.broadcast %88 : vector<1x128xf32> to vector<16x128xf32>
    %90 = vector.extract_strided_slice %85 {offsets = [0, 0], sizes = [16, 128], strides = [1, 1]} : vector<18x144xf32> to vector<16x128xf32>
    %91 = vector.extract_strided_slice %86 {offsets = [0, 0, 0], sizes = [1, 1, 128], strides = [1, 1, 1]} : vector<3x3x128xf32> to vector<1x1x128xf32>
    %92 = vector.shape_cast %91 : vector<1x1x128xf32> to vector<128xf32>
    %93 = vector.shape_cast %92 : vector<128xf32> to vector<1x128xf32>
    %94 = vector.broadcast %93 : vector<1x128xf32> to vector<16x128xf32>
    %95 = arith.mulf %90, %94 : vector<16x128xf32>
    %96 = arith.addf %89, %95 : vector<16x128xf32>
    %97 = vector.extract_strided_slice %85 {offsets = [0, 8], sizes = [16, 128], strides = [1, 1]} : vector<18x144xf32> to vector<16x128xf32>
    %98 = vector.extract_strided_slice %86 {offsets = [0, 1, 0], sizes = [1, 1, 128], strides = [1, 1, 1]} : vector<3x3x128xf32> to vector<1x1x128xf32>
    %99 = vector.shape_cast %98 : vector<1x1x128xf32> to vector<128xf32>
    %100 = vector.shape_cast %99 : vector<128xf32> to vector<1x128xf32>
    %101 = vector.broadcast %100 : vector<1x128xf32> to vector<16x128xf32>
    %102 = arith.mulf %97, %101 : vector<16x128xf32>
    %103 = arith.addf %96, %102 : vector<16x128xf32>
    %104 = vector.extract_strided_slice %85 {offsets = [0, 16], sizes = [16, 128], strides = [1, 1]} : vector<18x144xf32> to vector<16x128xf32>
    %105 = vector.extract_strided_slice %86 {offsets = [0, 2, 0], sizes = [1, 1, 128], strides = [1, 1, 1]} : vector<3x3x128xf32> to vector<1x1x128xf32>
    %106 = vector.shape_cast %105 : vector<1x1x128xf32> to vector<128xf32>
    %107 = vector.shape_cast %106 : vector<128xf32> to vector<1x128xf32>
    %108 = vector.broadcast %107 : vector<1x128xf32> to vector<16x128xf32>
    %109 = arith.mulf %104, %108 : vector<16x128xf32>
    %110 = arith.addf %103, %109 : vector<16x128xf32>
    %111 = vector.extract_strided_slice %85 {offsets = [1, 0], sizes = [16, 128], strides = [1, 1]} : vector<18x144xf32> to vector<16x128xf32>
    %112 = vector.extract_strided_slice %86 {offsets = [1, 0, 0], sizes = [1, 1, 128], strides = [1, 1, 1]} : vector<3x3x128xf32> to vector<1x1x128xf32>
    %113 = vector.shape_cast %112 : vector<1x1x128xf32> to vector<128xf32>
    %114 = vector.shape_cast %113 : vector<128xf32> to vector<1x128xf32>
    %115 = vector.broadcast %114 : vector<1x128xf32> to vector<16x128xf32>
    %116 = arith.mulf %111, %115 : vector<16x128xf32>
    %117 = arith.addf %110, %116 : vector<16x128xf32>
    %118 = vector.extract_strided_slice %85 {offsets = [1, 8], sizes = [16, 128], strides = [1, 1]} : vector<18x144xf32> to vector<16x128xf32>
    %119 = vector.extract_strided_slice %86 {offsets = [1, 1, 0], sizes = [1, 1, 128], strides = [1, 1, 1]} : vector<3x3x128xf32> to vector<1x1x128xf32>
    %120 = vector.shape_cast %119 : vector<1x1x128xf32> to vector<128xf32>
    %121 = vector.shape_cast %120 : vector<128xf32> to vector<1x128xf32>
    %122 = vector.broadcast %121 : vector<1x128xf32> to vector<16x128xf32>
    %123 = arith.mulf %118, %122 : vector<16x128xf32>
    %124 = arith.addf %117, %123 : vector<16x128xf32>
    %125 = vector.extract_strided_slice %85 {offsets = [1, 16], sizes = [16, 128], strides = [1, 1]} : vector<18x144xf32> to vector<16x128xf32>
    %126 = vector.extract_strided_slice %86 {offsets = [1, 2, 0], sizes = [1, 1, 128], strides = [1, 1, 1]} : vector<3x3x128xf32> to vector<1x1x128xf32>
    %127 = vector.shape_cast %126 : vector<1x1x128xf32> to vector<128xf32>
    %128 = vector.shape_cast %127 : vector<128xf32> to vector<1x128xf32>
    %129 = vector.broadcast %128 : vector<1x128xf32> to vector<16x128xf32>
    %130 = arith.mulf %125, %129 : vector<16x128xf32>
    %131 = arith.addf %124, %130 : vector<16x128xf32>
    %132 = vector.extract_strided_slice %85 {offsets = [2, 0], sizes = [16, 128], strides = [1, 1]} : vector<18x144xf32> to vector<16x128xf32>
    %133 = vector.extract_strided_slice %86 {offsets = [2, 0, 0], sizes = [1, 1, 128], strides = [1, 1, 1]} : vector<3x3x128xf32> to vector<1x1x128xf32>
    %134 = vector.shape_cast %133 : vector<1x1x128xf32> to vector<128xf32>
    %135 = vector.shape_cast %134 : vector<128xf32> to vector<1x128xf32>
    %136 = vector.broadcast %135 : vector<1x128xf32> to vector<16x128xf32>
    %137 = arith.mulf %132, %136 : vector<16x128xf32>
    %138 = arith.addf %131, %137 : vector<16x128xf32>
    %139 = vector.extract_strided_slice %85 {offsets = [2, 8], sizes = [16, 128], strides = [1, 1]} : vector<18x144xf32> to vector<16x128xf32>
    %140 = vector.extract_strided_slice %86 {offsets = [2, 1, 0], sizes = [1, 1, 128], strides = [1, 1, 1]} : vector<3x3x128xf32> to vector<1x1x128xf32>
    %141 = vector.shape_cast %140 : vector<1x1x128xf32> to vector<128xf32>
    %142 = vector.shape_cast %141 : vector<128xf32> to vector<1x128xf32>
    %143 = vector.broadcast %142 : vector<1x128xf32> to vector<16x128xf32>
    %144 = arith.mulf %139, %143 : vector<16x128xf32>
    %145 = arith.addf %138, %144 : vector<16x128xf32>
    %146 = vector.extract_strided_slice %85 {offsets = [2, 16], sizes = [16, 128], strides = [1, 1]} : vector<18x144xf32> to vector<16x128xf32>
    %147 = vector.extract_strided_slice %86 {offsets = [2, 2, 0], sizes = [1, 1, 128], strides = [1, 1, 1]} : vector<3x3x128xf32> to vector<1x1x128xf32>
    %148 = vector.shape_cast %147 : vector<1x1x128xf32> to vector<128xf32>
    %149 = vector.shape_cast %148 : vector<128xf32> to vector<1x128xf32>
    %150 = vector.broadcast %149 : vector<1x128xf32> to vector<16x128xf32>
    %151 = arith.mulf %146, %150 : vector<16x128xf32>
    %152 = arith.addf %145, %151 : vector<16x128xf32>
    %cst_22 = arith.constant 0.000000e+00 : f32
    %153 = vector.broadcast %cst_22 : f32 to vector<16x128xf32>
    %154 = arith.maximumf %152, %153 : vector<16x128xf32>
    %c0_23 = arith.constant 0 : index
    %c0_24 = arith.constant 0 : index
    %155 = vector.load %arg8[%c0_23, %c0_24] : memref<128x128xf32, #tpu.memory_space<vmem>>, vector<128x128xf32>
    %cst_25 = arith.constant dense<0.000000e+00> : vector<16x128xf32>
    %156 = tpu.matmul %154, %155, %cst_25 {dimension_numbers = #tpu.dot_dimension_numbers<[1], [0], [0], [1], [0, 0, 1, 1], [], []>} : vector<16x128xf32>, vector<128x128xf32>, vector<16x128xf32> -> vector<16x128xf32>
    %c0_26 = arith.constant 0 : index
    %c0_27 = arith.constant 0 : index
    %157 = vector.load %arg9[%c0_26, %c0_27] : memref<1x128xf32, #tpu.memory_space<vmem>>, vector<1x128xf32>
    %158 = vector.broadcast %157 : vector<1x128xf32> to vector<16x128xf32>
    %159 = arith.addf %156, %158 : vector<16x128xf32>
    %cst_28 = arith.constant 0.000000e+00 : f32
    %160 = vector.broadcast %cst_28 : f32 to vector<16x128xf32>
    %161 = arith.maximumf %159, %160 : vector<16x128xf32>
    %c0_29 = arith.constant 0 : index
    %c0_30 = arith.constant 0 : index
    %c0_31 = arith.constant 0 : index
    %162 = vector.load %arg10[%c0_29, %c0_30, %c0_31] : memref<1x16x128xf32, #tpu.memory_space<vmem>>, vector<1x16x128xf32>
    %163 = vector.shape_cast %162 : vector<1x16x128xf32> to vector<16x128xf32>
    %164 = vector.shape_cast %161 : vector<16x128xf32> to vector<1x16x128xf32>
    tpu.vector_store %arg10[%c0_29, %c0_30, %c0_31], %164 {strides = array<i32>} : memref<1x16x128xf32, #tpu.memory_space<vmem>>, vector<1x16x128xf32>,
    return
  }
  func.func @transform_0(%arg0: i32) -> (i32, i32, i32) {
    %c0_i32 = arith.constant 0 : i32
    %c0_i32_0 = arith.constant 0 : i32
    %c0_i32_1 = arith.constant 0 : i32
    return %arg0, %c0_i32, %c0_i32_0 : i32, i32, i32
  }
  func.func @transform_1(%arg0: i32) -> (i32, i32, i32) {
    %c0_i32 = arith.constant 0 : i32
    %c0_i32_0 = arith.constant 0 : i32
    %c0_i32_1 = arith.constant 0 : i32
    %c0_i32_2 = arith.constant 0 : i32
    return %c0_i32, %c0_i32_0, %c0_i32_1 : i32, i32, i32
  }
  func.func @transform_2(%arg0: i32) -> (i32, i32) {
    %c0_i32 = arith.constant 0 : i32
    %c0_i32_0 = arith.constant 0 : i32
    %c0_i32_1 = arith.constant 0 : i32
    return %c0_i32, %c0_i32_0 : i32, i32
  }
  func.func @transform_3(%arg0: i32) -> (i32, i32) {
    %c0_i32 = arith.constant 0 : i32
    %c0_i32_0 = arith.constant 0 : i32
    %c0_i32_1 = arith.constant 0 : i32
    return %c0_i32, %c0_i32_0 : i32, i32
  }
  func.func @transform_4(%arg0: i32) -> (i32, i32) {
    %c0_i32 = arith.constant 0 : i32
    %c0_i32_0 = arith.constant 0 : i32
    %c0_i32_1 = arith.constant 0 : i32
    return %c0_i32, %c0_i32_0 : i32, i32
  }
  func.func @transform_5(%arg0: i32) -> (i32, i32, i32) {
    %c0_i32 = arith.constant 0 : i32
    %c0_i32_0 = arith.constant 0 : i32
    %c0_i32_1 = arith.constant 0 : i32
    %c0_i32_2 = arith.constant 0 : i32
    return %c0_i32, %c0_i32_0, %c0_i32_1 : i32, i32, i32
  }
  func.func @transform_6(%arg0: i32) -> (i32, i32) {
    %c0_i32 = arith.constant 0 : i32
    %c0_i32_0 = arith.constant 0 : i32
    %c0_i32_1 = arith.constant 0 : i32
    return %c0_i32, %c0_i32_0 : i32, i32
  }
  func.func @transform_7(%arg0: i32) -> (i32, i32) {
    %c0_i32 = arith.constant 0 : i32
    %c0_i32_0 = arith.constant 0 : i32
    %c0_i32_1 = arith.constant 0 : i32
    return %c0_i32, %c0_i32_0 : i32, i32
  }
  func.func @transform_8(%arg0: i32) -> (i32, i32) {
    %c0_i32 = arith.constant 0 : i32
    %c0_i32_0 = arith.constant 0 : i32
    %c0_i32_1 = arith.constant 0 : i32
    return %c0_i32, %c0_i32_0 : i32, i32
  }
  func.func @transform_9(%arg0: i32) -> (i32, i32, i32) {
    %c0_i32 = arith.constant 0 : i32
    %c0_i32_0 = arith.constant 0 : i32
    %c0_i32_1 = arith.constant 0 : i32
    return %arg0, %c0_i32, %c0_i32_0 : i32, i32, i32
  }
}

</mosaic_0001>

<bundles_post_ra>
// kernel: lsfe_forward.1
= control target key start
LH: loop header
LB: loop body
LE: loop exit
PB: predicated region body
PF: predicated region fallthrough
CT: control target
= control target key end

     0   :  { %s1378_s30 = smov 0   ;;  %s1758_s0 = inlined_call_operand.vmem [shape: f32[2,16,64], index: 0, kind: input, shape index: {}]   ;;  %s1759_s1 = inlined_call_operand.vmem [shape: f32[3,3,64], index: 1, kind: input, shape index: {}]   ;;  %s1760_s2 = inlined_call_operand.vmem [shape: f32[1,64], index: 2, kind: input, shape index: {}]   ;;  %s1761_s3 = inlined_call_operand.vmem [shape: f32[64,128], index: 3, kind: input, shape index: {}]   ;;  %s1762_s4 = inlined_call_operand.vmem [shape: f32[1,128], index: 4, kind: input, shape index: {}]   ;;  %s1763_s5 = inlined_call_operand.vmem [shape: f32[3,3,128], index: 5, kind: input, shape index: {}]   ;;  %s1764_s6 = inlined_call_operand.vmem [shape: f32[1,128], index: 6, kind: input, shape index: {}]   ;;  %s1765_s7 = inlined_call_operand.vmem [shape: f32[128,128], index: 7, kind: input, shape index: {}]   ;;  %s1766_s8 = inlined_call_operand.vmem [shape: f32[1,128], index: 8, kind: input, shape index: {}]   ;;  %s1767_s9 = inlined_call_operand.vmem [shape: f32[2,16,128], index: 9, kind: output, shape index: {}]  }
   0x1 LB: > { %s1151_s10 = sadd.s32 4294967295, %s1320_s30   ;;  %p1155_p0 = scmp.ge.s32.totalorder %s1320_s30, 1  ;;  %s1320_s30 = sphi %s1378_s30, %s19_s30  }
   0x2   : > { %p287_p1 = scmp.lt.s32.totalorder %s1320_s30, 3 }
   0x4   : > { %p288_p2 = pnand %p1155_p0, %p287_p1 }
   0x5   : > { %v374_v0 = vlaneseq (!%p288_p2)  ;;  %p323_p3 = scmp.lt.s32.totalorder (!%p288_p2), %s1151_s10, 1  ;;  %v364_v2 = vld [vmem:[%s1759_s1] sm:$0x7] (!%p288_p2)  ;;  %vm337_vm0 = vcmask (!%p288_p2), 1040384   ;;  %s1322_s17 = smov (!%p288_p2), 4   ;;  %vm356_vm1 = vcmask (!%p288_p2), 31744  }
   0x6   : > { %291 = sbr.rel (%p288_p2) target bundleno = 1002 (0x3ea), region = 56  ;;  %v365_v11 = vld [vmem:[%s1759_s1 + $0x4] sm:$0x7] (!%p288_p2)  ;;  %v366_v15 = vld [vmem:[%s1759_s1 + $0x8] sm:$0x7] (!%p288_p2)  ;;  %s1323_s22 = smov (!%p288_p2), 8  }
   0x7   : > { %v375_v1 = vshrl.u32 (!%p288_p2), %v374_v0, 7  ;;  %vm360_vm2 = vcmask (!%p288_p2), 556032   ;;  %v572_v29 = vld [vmem:[%s1761_s3] sm:$0xff] (!%p288_p2)  ;;  %v573_v30 = vld [vmem:[%s1761_s3 + $0x8] sm:$0xff] (!%p288_p2)  ;;  %s1324_s27 = smov (!%p288_p2), 124   ;;  %v574_v43 = vld [vmem:[%s1761_s3 + $0x10] sm:$0xff] (!%p288_p2) }
   0x8   : > { %v1252_v37 = vpack.c.bf16 (!%p288_p2), %v573_v30, %v572_v29  ;;  %v575_v44 = vld [vmem:[%s1761_s3 + $0x18] sm:$0xff] (!%p288_p2)  ;;  %vm432_vm3 = vcmask (!%p288_p2), 1046528   ;;  %s1325_s14 = smov (!%p288_p2), 120   ;;  %vm506_vm4 = vcmask (!%p288_p2), 1045504   ;;  %vm587_vm5 = vcmask (!%p288_p2), 523264   ;;  %s1326_s28 = smov (!%p288_p2), 16  }
   0x9   : > { %v1391_v3 = vsub.s32 (!%p288_p2), 1, %v375_v1  ;;  %v1405_v12 = vsub.s32 (!%p288_p2), 2, %v375_v1  ;;  %v1419_v20 = vsub.s32 (!%p288_p2), 0, %v375_v1  ;;  %v1256_v54 = vpack.c.bf16 (!%p288_p2), %v575_v44, %v574_v43 }
   0xa   : > { %1253 = vmatprep.subr.bf16.mxu0 (!%p288_p2), %v1252_v37  ;;  %vm691_vm6 = vcmask (!%p288_p2), 64512   ;;  %vm740_vm7 = vcmask (!%p288_p2), 982016   ;;  %vm771_vm8 = vcmask (!%p288_p2), 916480  }
   0xb   : > { %v385_v4 = vrot.slane (!%p288_p2), %v364_v2, %v1391_v3  ;;  %v445_v14 = vrot.slane (!%p288_p2), %v365_v11, %v1391_v3  ;;  %v405_v16 = vrot.slane (!%p288_p2), %v364_v2, %v1405_v12  ;;  %v519_v17 = vrot.slane (!%p288_p2), %v366_v15, %v1391_v3  ;;  %1255 = vmatpush3.bf16.msra.mxu0 (!%p288_p2), %v1252_v37 }
   0xc   : > { %v472_v18 = vrot.slane (!%p288_p2), %v365_v11, %v1405_v12  ;;  %v546_v19 = vrot.slane (!%p288_p2), %v366_v15, %v1405_v12  ;;  %v377_v22 = vrot.slane (!%p288_p2), %v364_v2, %v1419_v20  ;;  %v425_v23 = vrot.slane (!%p288_p2), %v365_v11, %v1419_v20  ;;  %1257 = vmatprep.subr.bf16.mxu0 (!%p288_p2), %v1256_v54 }
   0xd   : > { %s1769_s10 = smov (!%p323_p3, %s1151_s10), 1  ;;  %387 = vrot.lane.b32.xlu1 %v385_v4, %s1322_s17  ;;  %v499_v24 = vrot.slane %v366_v15, %v1419_v20 }
   0xe   : > { %s1168_s13 = sshll.u32 %s1769_s10, 4 }
   0xf   : > { %s327_s16 = scalar_lea.vmem %s1758_s0, %s1168_s13  ;;  %1259 = vmatpush3.bf16.msra.mxu0 %v1256_v54  ;;  %s332_s23 = scalar_lea.vmem %s1767_s9, %s1168_s13 }
  0x10   : > { %v333_v5 = vld [vmem:[%s327_s16] sm:$0xff]  ;;  %v334_v6 = vld [vmem:[%s327_s16 + $0x8] sm:$0xff] }
  0x11   : > { %v338_v7 = vrot.slane %v333_v5, 7  ;;  %v339_v8 = vrot.slane %v334_v6, 7  ;;  %v576_v6 = vld [vmem:[%s1761_s3 + $0x20] sm:$0xff] }
  0x13   : > { %v343_v9 = vsel %vm337_vm0, 0.0, %v338_v7  ;;  %v344_v10 = vsel %vm337_vm0, %v339_v8, 0.0  ;;  %v340_v13 = vsel %vm337_vm0, %v338_v7, %v339_v8  ;;  %v577_v7 = vld [vmem:[%s1761_s3 + $0x28] sm:$0xff] }
  0x14   : > { %347 = vrot.lane.b32.xlu0 %v343_v9, %s1322_s17  ;;  %351 = vrot.lane.b32.xlu1 %v344_v10, %s1322_s17 }
  0x18   : > { %349 = vrot.lane.b32.xlu0 %v340_v13, %s1322_s17  ;;  %447 = vrot.lane.b32.xlu1 %v445_v14, %s1322_s17 }
  0x1c   : > { %407 = vrot.lane.b32.xlu0 %v405_v16, %s1323_s22  ;;  %521 = vrot.lane.b32.xlu1 %v519_v17, %s1322_s17 }
  0x20   : > { %474 = vrot.lane.b32.xlu0 %v472_v18, %s1323_s22 }
  0x24   : > { %548 = vrot.lane.b32.xlu0 %v546_v19, %s1323_s22  ;;  %v1260_v19 = vpack.c.bf16 %v577_v7, %v576_v6 }
  0x26   : > { %1261 = vmatprep.subr.bf16.mxu0 %v1260_v19 }
  0x27   : > { %1263 = vmatpush3.bf16.msra.mxu0 %v1260_v19 }
  0x7f   : > { %v388_v21 = vpop.permute.xlu1 %387 }
  0x86   : > { %v348_v25 = vpop.permute.xlu0 %347  ;;  %v352_v28 = vpop.permute.xlu1 %351 }
  0x87   : > { %v357_v26 = vsel %vm356_vm1, 0.0, %v348_v25  ;;  %v359_v31 = vsel %vm356_vm1, 0.0, %v352_v28 }
  0x88   : > { %v1426_v27 = vsel %vm360_vm2, %v357_v26, 0.0  ;;  %v1441_v35 = vsel %vm360_vm2, %v359_v31, 0.0 }
  0x89   : > { %v390_v32 = vmul.f32 %v388_v21, %v1426_v27  ;;  %v1437_v33 = vmul.f32 %v377_v22, %v1426_v27  ;;  %v426_v34 = vmul.f32 %v425_v23, %v1426_v27  ;;  %v500_v38 = vmul.f32 %v499_v24, %v1426_v27 }
  0x8a   : > { %v350_v36 = vpop.permute.xlu0 %349  ;;  %v428_v40 = vmul.f32 %v425_v23, %v1441_v35  ;;  %v448_v42 = vpop.permute.xlu1 %447  ;;  %v502_v45 = vmul.f32 %v499_v24, %v1441_v35 }
  0x8b   : > { %v358_v39 = vsel %vm356_vm1, 0.0, %v350_v36  ;;  %394 = vrot.lane.b32.xlu1 %v390_v32, %s1324_s27  ;;  %v450_v46 = vmul.f32 %v448_v42, %v1426_v27  ;;  %v452_v48 = vmul.f32 %v448_v42, %v1441_v35  ;;  %v433_v59 = vrot.slane %v426_v34, 1  ;;  %v578_v32 = vld [vmem:[%s1761_s3 + $0x30] sm:$0xff]  ;;  %v579_v34 = vld [vmem:[%s1761_s3 + $0x38] sm:$0xff] }
  0x8c   : > { %v362_v41 = vsel %vm360_vm2, %v358_v39, 0.0  ;;  %v436_v53 = vrot.slane %v428_v40, 1  ;;  %v507_v63 = vrot.slane %v500_v38, 2  ;;  %v510_v16 = vrot.slane %v502_v45, 2  ;;  %v1160_v45 = vld [vmem:[%s1760_s2] ss:$0 sm:$0xff] }
  0x8d   : > { %v451_v47 = vmul.f32 %v448_v42, %v362_v41  ;;  %v391_v49 = vmul.f32 %v388_v21, %v362_v41  ;;  %v1457_v51 = vmul.f32 %v377_v22, %v362_v41  ;;  %v427_v52 = vmul.f32 %v425_v23, %v362_v41 }
  0x8e   : > { %v408_v50 = vpop.permute.xlu0 %407  ;;  %v456_v55 = vrot.slane %v450_v46, 1  ;;  %v522_v58 = vpop.permute.xlu1 %521  ;;  %v501_v61 = vmul.f32 %v499_v24, %v362_v41  ;;  %v459_v0 = vrot.slane %v452_v48, 1  ;;  %v1264_v36 = vpack.c.bf16 %v579_v34, %v578_v32  ;;  %v1532_v34 = vld [vmem:[%s1763_s5 + $0x8] sm:$0x7] }
  0x8f   : > { %v457_v56 = vrot.slane %v451_v47, 1  ;;  %v410_v57 = vmul.f32 %v408_v50, %v1426_v27  ;;  %396 = vrot.lane.b32.xlu0 %v391_v49, %s1324_s27  ;;  %v434_v60 = vrot.slane %v427_v52, 1  ;;  %v411_v62 = vmul.f32 %v408_v50, %v362_v41 }
  0x90   : > { %v508_v5 = vrot.slane %v501_v61, 2  ;;  %v524_v8 = vmul.f32 %v522_v58, %v1426_v27  ;;  %v525_v9 = vmul.f32 %v522_v58, %v362_v41  ;;  %v526_v17 = vmul.f32 %v522_v58, %v1441_v35  ;;  %1265 = vmatprep.subr.bf16.mxu0 %v1264_v36 }
  0x91   : > { %414 = vrot.lane.b32.xlu1 %v410_v57, %s1325_s14  ;;  %v1463_v2 = vsel %vm432_vm3, %v433_v59, %v434_v60  ;;  %v1466_v4 = vsel %vm432_vm3, %v434_v60, %v436_v53  ;;  %v458_v11 = vsel %vm432_vm3, %v456_v55, %v457_v56  ;;  %v460_v24 = vsel %vm432_vm3, %v457_v56, %v459_v0 }
  0x92   : > { %v475_v1 = vpop.permute.xlu0 %474  ;;  %v509_v15 = vsel %vm506_vm4, %v507_v63, %v508_v5  ;;  %v511_v25 = vsel %vm506_vm4, %v508_v5, %v510_v16  ;;  %v530_v26 = vrot.slane %v524_v8, 2  ;;  %v531_v28 = vrot.slane %v525_v9, 2  ;;  %1267 = vmatpush3.bf16.msra.mxu0 %v1264_v36  ;;  %v698_v16 = vld [vmem:[%s1763_s5] sm:$0x7] }
  0x93   : > { %v477_v10 = vmul.f32 %v475_v1, %v1426_v27  ;;  %416 = vrot.lane.b32.xlu0 %v411_v62, %s1325_s14  ;;  %v478_v13 = vmul.f32 %v475_v1, %v362_v41  ;;  %v479_v14 = vmul.f32 %v475_v1, %v1441_v35  ;;  %v533_v37 = vrot.slane %v526_v17, 2 }
  0x94   : > { %v380_v47 = vadd.f32 %v1160_v45, %v1437_v33  ;;  %v381_v50 = vadd.f32 %v1160_v45, %v1457_v51  ;;  %v719_v17 = vrot.slane %v698_v16, %v1391_v3 }
  0x95   : > { %v483_v18 = vrot.slane %v477_v10, 1  ;;  %461 = vrot.lane.b32.xlu1 %v458_v11, %s1324_s27  ;;  %v484_v21 = vrot.slane %v478_v13, 1  ;;  %v486_v22 = vrot.slane %v479_v14, 1  ;;  %v534_v43 = vsel %vm506_vm4, %v531_v28, %v533_v37 }
  0x96   : > { %v549_v23 = vpop.permute.xlu0 %548 }
  0x97   : > { %463 = vrot.lane.b32.xlu0 %v460_v24, %s1324_s27  ;;  %v551_v29 = vmul.f32 %v549_v23, %v1426_v27  ;;  %v552_v30 = vmul.f32 %v549_v23, %v362_v41  ;;  %v485_v31 = vsel %vm432_vm3, %v483_v18, %v484_v21  ;;  %v553_v38 = vmul.f32 %v549_v23, %v1441_v35  ;;  %v1161_v18 = vld [vmem:[%s1762_s4] ss:$0 sm:$0xff] }
  0x98   : > { %v487_v27 = vsel %vm432_vm3, %v484_v21, %v486_v22  ;;  %v532_v41 = vsel %vm506_vm4, %v530_v26, %v531_v28 }
  0x99   : > { %488 = vrot.lane.b32.xlu1 %v485_v31, %s1325_s14  ;;  %v557_v39 = vrot.slane %v551_v29, 2  ;;  %v558_v40 = vrot.slane %v552_v30, 2  ;;  %v560_v42 = vrot.slane %v553_v38, 2  ;;  %v699_v29 = vld [vmem:[%s1763_s5 + $0x4] sm:$0x7]  ;;  %v907_v38 = vrot.slane %v1532_v34, %v1391_v3 }
  0x9a   : > { %v800_v32 = vrot.slane %v699_v29, %v1391_v3  ;;  %v844_v37 = vrot.slane %v699_v29, %v1405_v12 }
  0x9b   : > { %490 = vrot.lane.b32.xlu0 %v487_v27, %s1325_s14  ;;  %v559_v44 = vsel %vm506_vm4, %v557_v39, %v558_v40  ;;  %v561_v35 = vsel %vm506_vm4, %v558_v40, %v560_v42  ;;  %v951_v27 = vrot.slane %v1532_v34, %v1405_v12  ;;  %v1545_v42 = vrot.slane %v699_v29, %v1419_v20 }
  0x9d   : > { %535 = vrot.lane.b32.xlu1 %v532_v41, %s1324_s27  ;;  %v711_v41 = vrot.slane %v698_v16, %v1419_v20 }
  0x9f   : > { %537 = vrot.lane.b32.xlu0 %v534_v43, %s1324_s27 }
  0xa1   : > { %562 = vrot.lane.b32.xlu1 %v559_v44, %s1325_s14 }
  0xa3   : > { %564 = vrot.lane.b32.xlu0 %v561_v35, %s1325_s14 }
  0xa5   : > { %721 = vrot.lane.b32.xlu1 %v719_v17, %s1323_s22  ;;  %v888_v17 = vrot.slane %v1532_v34, %v1419_v20 }
  0xfd   : > { %v395_v46 = vpop.permute.xlu1 %394 }
  0xfe   : > { %v400_v49 = vadd.f32 %v395_v46, %v380_v47 }
 0x101   : > { %v397_v48 = vpop.permute.xlu0 %396 }
 0x102   : > { %v401_v53 = vadd.f32 %v397_v48, %v381_v50 }
 0x103   : > { %v415_v52 = vpop.permute.xlu1 %414 }
 0x104   : > { %v420_v54 = vadd.f32 %v415_v52, %v400_v49 }
 0x105   : > { %v417_v55 = vpop.permute.xlu0 %416 }
 0x106   : > { %v421_v56 = vadd.f32 %v417_v55, %v401_v53  ;;  %v440_v57 = vadd.f32 %v1463_v2, %v420_v54 }
 0x107   : > { %v462_v58 = vpop.permute.xlu1 %461 }
 0x108   : > { %v441_v59 = vadd.f32 %v1466_v4, %v421_v56  ;;  %v467_v61 = vadd.f32 %v462_v58, %v440_v57 }
 0x109   : > { %v464_v60 = vpop.permute.xlu0 %463 }
 0x10a   : > { %v468_v63 = vadd.f32 %v464_v60, %v441_v59 }
 0x10b   : > { %v489_v62 = vpop.permute.xlu1 %488 }
 0x10c   : > { %v494_v0 = vadd.f32 %v489_v62, %v467_v61 }
 0x10d   : > { %v491_v33 = vpop.permute.xlu0 %490 }
 0x10e   : > { %v495_v1 = vadd.f32 %v491_v33, %v468_v63  ;;  %v514_v5 = vadd.f32 %v509_v15, %v494_v0  ;;  %v750_v15 = vrot.slane %v698_v16, %v1405_v12  ;;  %v994_v16 = vld [vmem:[%s1765_s7] sm:$0xff] }
 0x10f   : > { %v536_v6 = vpop.permute.xlu1 %535 }
 0x110   : > { %v515_v51 = vadd.f32 %v511_v25, %v495_v1  ;;  %v541_v8 = vadd.f32 %v536_v6, %v514_v5  ;;  %752 = vrot.lane.b32.xlu0 %v750_v15, %s1326_s28  ;;  %v995_v15 = vld [vmem:[%s1765_s7 + $0x8] sm:$0xff] }
 0x111   : > { %v538_v7 = vpop.permute.xlu0 %537 }
 0x112   : > { %v542_v10 = vadd.f32 %v538_v7, %v515_v51 }
 0x113   : > { %v563_v9 = vpop.permute.xlu1 %562 }
 0x114   : > { %v568_v11 = vadd.f32 %v563_v9, %v541_v8 }
 0x115   : > { %v565_v13 = vpop.permute.xlu0 %564 }
 0x116   : > { %v570_v2 = vmax.f32 %v568_v11, 0.0  ;;  %v569_v14 = vadd.f32 %v565_v13, %v542_v10 }
 0x117   : > { %v722_v39 = vpop.permute.xlu1 %721 }
 0x118   : > { %v571_v4 = vmax.f32 %v569_v14, 0.0  ;;  %1214 = vmatprep.mubr.msk.f32.mxu0 %vm587_vm5, %v570_v2 }
 0x11a   : > { %1215 = vmatmul.mubr.msk.f32.vlgmr.msra.gmra.mrb[0].mxu0 %vm587_vm5, %v571_v4 }
 0x182   : > { %v753_v40 = vpop.permute.xlu0 %752 }
 0x1ed   : > { %v1216_v19 = vpop.f32.mrb[0].mxu0 }
 0x1ee   : > { %v666_v21 = vadd.f32 %v1216_v19, %v1161_v18  ;;  %v660_v22 = vpop.f32.mrb[1].mxu0 }
 0x1ef   : > { %v661_v23 = vadd.f32 %v1161_v18, %v660_v22  ;;  %v997_v22 = vld [vmem:[%s1765_s7 + $0x18] sm:$0xff] }
 0x1f0   : > { %v670_v24 = vmax.f32 %v666_v21, 0.0  ;;  %v996_v21 = vld [vmem:[%s1765_s7 + $0x10] sm:$0xff] }
 0x1f1   : > { %v669_v25 = vmax.f32 %v661_v23, 0.0 }
 0x1f2   : > { %v674_v26 = vrot.slane %v670_v24, 7 }
 0x1f3   : > { %v673_v28 = vrot.slane %v669_v25, 7 }
 0x1f4   : > { %v679_v36 = vsel %vm337_vm0, %v674_v26, 0.0 }
 0x1f5   : > { %v678_v30 = vsel %vm337_vm0, 0.0, %v673_v28  ;;  %v675_v31 = vsel %vm337_vm0, %v673_v28, %v674_v26 }
 0x1f6   : > { %682 = vrot.lane.b32.xlu1 %v678_v30, %s1323_s22  ;;  %684 = vrot.lane.b32.xlu0 %v675_v31, %s1323_s22  ;;  %v1268_v31 = vpack.c.bf16 %v995_v15, %v994_v16  ;;  %v1002_v16 = vld [vmem:[%s1765_s7 + $0x40] sm:$0xff]  ;;  %v1003_v15 = vld [vmem:[%s1765_s7 + $0x48] sm:$0xff] }
 0x1f8   : > { %1269 = vmatprep.subr.bf16.mxu1 %v1268_v31 }
 0x1f9   : > { %1271 = vmatpush3.bf16.msra.mxu1 %v1268_v31 }
 0x1fa   : > { %686 = vrot.lane.b32.xlu1 %v679_v36, %s1323_s22  ;;  %802 = vrot.lane.b32.xlu0 %v800_v32, %s1323_s22 }
 0x1fe   : > { %846 = vrot.lane.b32.xlu1 %v844_v37, %s1326_s28  ;;  %909 = vrot.lane.b32.xlu0 %v907_v38, %s1323_s22  ;;  %s1327_s22 = smov 112   ;;  %v1272_v37 = vpack.c.bf16 %v997_v22, %v996_v21  ;;  %v1284_v22 = vpack.c.bf16 %v1003_v15, %v1002_v16 }
 0x200   : > { %1273 = vmatprep.subr.bf16.mxu1 %v1272_v37 }
 0x201   : > { %1275 = vmatpush3.bf16.msra.mxu1 %v1272_v37 }
 0x202   : > { %953 = vrot.lane.b32.xlu1 %v951_v27, %s1326_s28 }
 0x268   : > { %v683_v43 = vpop.permute.xlu1 %682  ;;  %v685_v44 = vpop.permute.xlu0 %684 }
 0x269   : > { %v1548_v35 = vsel %vm691_vm6, 0.0, %v683_v43  ;;  %v1551_v3 = vsel %vm691_vm6, %v683_v43, 0.0  ;;  %v1554_v45 = vsel %vm691_vm6, 0.0, %v685_v44  ;;  %v1559_v47 = vsel %vm691_vm6, %v685_v44, 0.0  ;;  %v999_v43 = vld [vmem:[%s1765_s7 + $0x28] sm:$0xff] }
 0x26a   : > { %v725_v12 = vmul.f32 %v722_v39, %v1551_v3  ;;  %v724_v46 = vmul.f32 %v722_v39, %v1548_v35  ;;  %v1564_v48 = vmul.f32 %v711_v41, %v1548_v35  ;;  %v1567_v49 = vmul.f32 %v711_v41, %v1554_v45  ;;  %v998_v41 = vld [vmem:[%s1765_s7 + $0x20] sm:$0xff] }
 0x26b   : > { %v1571_v50 = vmul.f32 %v1545_v42, %v1548_v35  ;;  %v727_v53 = vmul.f32 %v722_v39, %v1559_v47  ;;  %v726_v54 = vmul.f32 %v722_v39, %v1554_v45  ;;  %v756_v58 = vmul.f32 %v753_v40, %v1551_v3 }
 0x26c   : > { %734 = vrot.lane.b32.xlu1 %v725_v12, %s1325_s14  ;;  %732 = vrot.lane.b32.xlu0 %v724_v46, %s1325_s14  ;;  %v687_v52 = vpop.permute.xlu1 %686  ;;  %v803_v55 = vpop.permute.xlu0 %802  ;;  %v755_v59 = vmul.f32 %v753_v40, %v1548_v35  ;;  %v758_v5 = vmul.f32 %v753_v40, %v1559_v47  ;;  %v757_v6 = vmul.f32 %v753_v40, %v1554_v45 }
 0x26d   : > { %v1578_v56 = vsel %vm691_vm6, 0.0, %v687_v52  ;;  %v1581_v57 = vsel %vm691_vm6, %v687_v52, 0.0  ;;  %v806_v60 = vmul.f32 %v803_v55, %v1551_v3  ;;  %v808_v61 = vmul.f32 %v803_v55, %v1559_v47 }
 0x26e   : > { %v805_v62 = vmul.f32 %v803_v55, %v1548_v35  ;;  %v807_v63 = vmul.f32 %v803_v55, %v1554_v45  ;;  %v810_v0 = vmul.f32 %v803_v55, %v1581_v57  ;;  %v809_v33 = vmul.f32 %v803_v55, %v1578_v56 }
 0x26f   : > { %v820_v51 = vrot.slane %v806_v60, 1  ;;  %v821_v7 = vrot.slane %v808_v61, 1  ;;  %v783_v29 = vmul.f32 %v1545_v42, %v1554_v45  ;;  %v788_v30 = vrot.slane %v1571_v50, 1 }
 0x270   : > { %738 = vrot.lane.b32.xlu1 %v727_v53, %s1325_s14  ;;  %736 = vrot.lane.b32.xlu0 %v726_v54, %s1325_s14  ;;  %v847_v1 = vpop.permute.xlu1 %846  ;;  %v817_v8 = vrot.slane %v805_v62, 1  ;;  %v818_v9 = vrot.slane %v807_v63, 1  ;;  %v825_v10 = vrot.slane %v810_v0, 1  ;;  %v823_v11 = vrot.slane %v809_v33, 1  ;;  %v910_v23 = vpop.permute.xlu0 %909  ;;  %v1000_v0 = vld [vmem:[%s1765_s7 + $0x30] sm:$0xff]  ;;  %v1001_v33 = vld [vmem:[%s1765_s7 + $0x38] sm:$0xff] }
 0x271   : > { %v850_v13 = vmul.f32 %v847_v1, %v1551_v3  ;;  %v1599_v2 = vmul.f32 %v847_v1, %v1559_v47  ;;  %v849_v14 = vmul.f32 %v847_v1, %v1548_v35  ;;  %v1603_v4 = vmul.f32 %v847_v1, %v1554_v45 }
 0x272   : > { %v822_v18 = vsel %vm432_vm3, %v820_v51, %v821_v7  ;;  %v819_v19 = vsel %vm432_vm3, %v817_v8, %v818_v9  ;;  %v826_v24 = vsel %vm432_vm3, %v821_v7, %v825_v10  ;;  %v824_v20 = vsel %vm432_vm3, %v818_v9, %v823_v11 }
 0x273   : > { %v864_v25 = vrot.slane %v850_v13, 1  ;;  %v865_v26 = vrot.slane %v1599_v2, 1  ;;  %v854_v28 = vmul.f32 %v847_v1, %v1581_v57  ;;  %v861_v32 = vrot.slane %v849_v14, 1 }
 0x274   : > { %765 = vrot.lane.b32.xlu1 %v756_v58, %s1327_s22  ;;  %763 = vrot.lane.b32.xlu0 %v755_v59, %s1327_s22  ;;  %v862_v34 = vrot.slane %v1603_v4, 1  ;;  %v784_v36 = vmul.f32 %v1545_v42, %v1578_v56  ;;  %v853_v38 = vmul.f32 %v847_v1, %v1578_v56  ;;  %v913_v27 = vmul.f32 %v910_v23, %v1551_v3  ;;  %v954_v11 = vpop.permute.xlu1 %953 }
 0x275   : > { %v1636_v39 = vmul.f32 %v910_v23, %v1559_v47  ;;  %v789_v40 = vrot.slane %v783_v29, 1  ;;  %v866_v42 = vsel %vm432_vm3, %v864_v25, %v865_v26  ;;  %v890_v12 = vmul.f32 %v888_v17, %v1554_v45 }
 0x276   : > { %v791_v44 = vrot.slane %v784_v36, 1  ;;  %v891_v46 = vmul.f32 %v888_v17, %v1578_v56  ;;  %v869_v50 = vrot.slane %v854_v28, 1  ;;  %v912_v52 = vmul.f32 %v910_v23, %v1548_v35  ;;  %v1005_v28 = vld [vmem:[%s1765_s7 + $0x58] sm:$0xff]  ;;  %v1006_v36 = vld [vmem:[%s1765_s7 + $0x60] sm:$0xff] }
 0x277   : > { %v1651_v53 = vsel %vm432_vm3, %v788_v30, %v789_v40  ;;  %v889_v54 = vmul.f32 %v888_v17, %v1548_v35  ;;  %v1276_v58 = vpack.c.bf16 %v999_v43, %v998_v41  ;;  %v896_v59 = vrot.slane %v890_v12, 2  ;;  %v1009_v41 = vld [vmem:[%s1765_s7 + $0x78] sm:$0xff] }
 0x278   : > { %769 = vrot.lane.b32.xlu1 %v758_v5, %s1327_s22  ;;  %767 = vrot.lane.b32.xlu0 %v757_v6, %s1327_s22  ;;  %v1655_v55 = vsel %vm432_vm3, %v789_v40, %v791_v44  ;;  %v898_v60 = vrot.slane %v891_v46, 2  ;;  %v863_v61 = vsel %vm432_vm3, %v861_v32, %v862_v34  ;;  %v867_v62 = vrot.slane %v853_v38, 1  ;;  %v1008_v40 = vld [vmem:[%s1765_s7 + $0x70] sm:$0xff] }
 0x279   : > { %v914_v63 = vmul.f32 %v910_v23, %v1554_v45  ;;  %v895_v1 = vrot.slane %v889_v54, 2  ;;  %v927_v6 = vrot.slane %v913_v27, 2  ;;  %v928_v51 = vrot.slane %v1636_v39, 2  ;;  %1277 = vmatprep.subr.bf16.mxu1 %v1276_v58 }
 0x27a   : > { %v1668_v5 = vsel %vm506_vm4, %v896_v59, %v898_v60  ;;  %v870_v8 = vsel %vm432_vm3, %v865_v26, %v869_v50  ;;  %v917_v9 = vmul.f32 %v910_v23, %v1581_v57  ;;  %v1280_v10 = vpack.c.bf16 %v1001_v33, %v1000_v0  ;;  %1279 = vmatpush3.bf16.msra.mxu1 %v1276_v58  ;;  %v1004_v26 = vld [vmem:[%s1765_s7 + $0x50] sm:$0xff]  ;;  %v1164_v50 = vld [vmem:[%s1764_s6] ss:$0 sm:$0xff] }
 0x27b   : > { %v1672_v7 = vsel %vm506_vm4, %v895_v1, %v896_v59  ;;  %v868_v13 = vsel %vm432_vm3, %v862_v34, %v867_v62  ;;  %v924_v2 = vrot.slane %v912_v52, 2  ;;  %v925_v14 = vrot.slane %v914_v63, 2 }
 0x27c   : > { %829 = vrot.lane.b32.xlu1 %v822_v18, %s1325_s14  ;;  %827 = vrot.lane.b32.xlu0 %v819_v19, %s1325_s14  ;;  %v916_v4 = vmul.f32 %v910_v23, %v1578_v56  ;;  %v929_v17 = vsel %vm506_vm4, %v927_v6, %v928_v51  ;;  %v932_v18 = vrot.slane %v917_v9, 2  ;;  %v957_v19 = vmul.f32 %v954_v11, %v1551_v3 }
 0x27d   : > { %v959_v21 = vmul.f32 %v954_v11, %v1559_v47  ;;  %1281 = vmatprep.subr.bf16.mxu1 %v1280_v10  ;;  %v926_v23 = vsel %vm506_vm4, %v924_v2, %v925_v14  ;;  %v958_v25 = vmul.f32 %v954_v11, %v1554_v45  ;;  %v961_v3 = vmul.f32 %v954_v11, %v1581_v57  ;;  %v1007_v57 = vld [vmem:[%s1765_s7 + $0x68] sm:$0xff] }
 0x27e   : > { %1283 = vmatpush3.bf16.msra.mxu1 %v1280_v10  ;;  %v933_v47 = vsel %vm506_vm4, %v928_v51, %v932_v18  ;;  %v1288_v45 = vpack.c.bf16 %v1005_v28, %v1004_v26  ;;  %v960_v34 = vmul.f32 %v954_v11, %v1578_v56  ;;  %v1292_v37 = vpack.c.bf16 %v1007_v57, %v1006_v36 }
 0x27f   : > { %v972_v29 = vrot.slane %v959_v21, 2  ;;  %1285 = vmatprep.subr.bf16.mxu1 %v1284_v22  ;;  %v969_v32 = vrot.slane %v958_v25, 2  ;;  %v976_v56 = vrot.slane %v961_v3, 2  ;;  %v1296_v43 = vpack.c.bf16 %v1009_v41, %v1008_v40 }
 0x280   : > { %833 = vrot.lane.b32.xlu1 %v826_v24, %s1325_s14  ;;  %831 = vrot.lane.b32.xlu0 %v824_v20, %s1325_s14  ;;  %v930_v24 = vrot.slane %v916_v4, 2  ;;  %v956_v20 = vmul.f32 %v954_v11, %v1548_v35  ;;  %v971_v35 = vrot.slane %v957_v19, 2  ;;  %v974_v39 = vrot.slane %v960_v34, 2 }
 0x281   : > { %v714_v59 = vadd.f32 %v1164_v50, %v1564_v48  ;;  %v715_v33 = vadd.f32 %v1164_v50, %v1567_v49 }
 0x282   : > { %v931_v30 = vsel %vm506_vm4, %v925_v14, %v930_v24  ;;  %v968_v31 = vrot.slane %v956_v20, 2  ;;  %1287 = vmatpush3.bf16.msra.mxu1 %v1284_v22  ;;  %v973_v38 = vsel %vm506_vm4, %v971_v35, %v972_v29  ;;  %v975_v44 = vsel %vm506_vm4, %v969_v32, %v974_v39 }
 0x283   : > { %1289 = vmatprep.subr.bf16.mxu1 %v1288_v45 }
 0x284   : > { %873 = vrot.lane.b32.xlu1 %v866_v42, %s1327_s22  ;;  %871 = vrot.lane.b32.xlu0 %v863_v61, %s1327_s22  ;;  %v970_v27 = vsel %vm506_vm4, %v968_v31, %v969_v32  ;;  %v977_v42 = vsel %vm506_vm4, %v972_v29, %v976_v56  ;;  %v1165_v56 = vld [vmem:[%s1766_s8] ss:$0 sm:$0xff] }
 0x286   : > { %1291 = vmatpush3.bf16.msra.mxu1 %v1288_v45 }
 0x287   : > { %1293 = vmatprep.subr.bf16.mxu1 %v1292_v37 }
 0x288   : > { %877 = vrot.lane.b32.xlu1 %v870_v8, %s1327_s22  ;;  %875 = vrot.lane.b32.xlu0 %v868_v13, %s1327_s22 }
 0x28a   : > { %1295 = vmatpush3.bf16.msra.mxu1 %v1292_v37 }
 0x28b   : > { %1297 = vmatprep.subr.bf16.mxu1 %v1296_v43 }
 0x28c   : > { %936 = vrot.lane.b32.xlu1 %v929_v17, %s1325_s14  ;;  %934 = vrot.lane.b32.xlu0 %v926_v23, %s1325_s14 }
 0x28e   : > { %1299 = vmatpush3.bf16.msra.mxu1 %v1296_v43 }
 0x290   : > { %940 = vrot.lane.b32.xlu1 %v933_v47, %s1325_s14  ;;  %938 = vrot.lane.b32.xlu0 %v931_v30, %s1325_s14 }
 0x294   : > { %980 = vrot.lane.b32.xlu1 %v973_v38, %s1327_s22  ;;  %978 = vrot.lane.b32.xlu0 %v970_v27, %s1327_s22 }
 0x298   : > { %984 = vrot.lane.b32.xlu1 %v977_v42, %s1327_s22  ;;  %982 = vrot.lane.b32.xlu0 %v975_v44, %s1327_s22 }
 0x2de   : > { %v735_v12 = vpop.permute.xlu1 %734  ;;  %v733_v46 = vpop.permute.xlu0 %732 }
 0x2df   : > { %v741_v58 = vsel %vm740_vm7, %v733_v46, %v735_v12 }
 0x2e0   : > { %v745_v60 = vadd.f32 %v741_v58, %v714_v59 }
 0x2e2   : > { %v739_v52 = vpop.permute.xlu1 %738  ;;  %v737_v54 = vpop.permute.xlu0 %736 }
 0x2e3   : > { %v742_v63 = vsel %vm740_vm7, %v737_v54, %v739_v52 }
 0x2e4   : > { %v746_v6 = vadd.f32 %v742_v63, %v715_v33 }
 0x2e6   : > { %v766_v61 = vpop.permute.xlu1 %765  ;;  %v764_v62 = vpop.permute.xlu0 %763 }
 0x2e7   : > { %v772_v0 = vsel %vm771_vm8, %v764_v62, %v766_v61 }
 0x2e8   : > { %v776_v1 = vadd.f32 %v772_v0, %v745_v60 }
 0x2ea   : > { %v770_v51 = vpop.permute.xlu1 %769  ;;  %v768_v8 = vpop.permute.xlu0 %767  ;;  %v795_v9 = vadd.f32 %v1651_v53, %v776_v1 }
 0x2eb   : > { %v773_v10 = vsel %vm771_vm8, %v768_v8, %v770_v51 }
 0x2ec   : > { %v777_v11 = vadd.f32 %v773_v10, %v746_v6 }
 0x2ee   : > { %v830_v48 = vpop.permute.xlu1 %829  ;;  %v828_v13 = vpop.permute.xlu0 %827  ;;  %v796_v2 = vadd.f32 %v1655_v55, %v777_v11 }
 0x2ef   : > { %v835_v16 = vsel %vm740_vm7, %v828_v13, %v830_v48 }
 0x2f0   : > { %v839_v15 = vadd.f32 %v835_v16, %v795_v9 }
 0x2f2   : > { %v834_v14 = vpop.permute.xlu1 %833  ;;  %v832_v4 = vpop.permute.xlu0 %831 }
 0x2f3   : > { %v836_v18 = vsel %vm740_vm7, %v832_v4, %v834_v14 }
 0x2f4   : > { %v840_v53 = vadd.f32 %v836_v18, %v796_v2 }
 0x2f6   : > { %v874_v17 = vpop.permute.xlu1 %873  ;;  %v872_v49 = vpop.permute.xlu0 %871 }
 0x2f7   : > { %v879_v19 = vsel %vm771_vm8, %v872_v49, %v874_v17 }
 0x2f8   : > { %v883_v21 = vadd.f32 %v879_v19, %v839_v15 }
 0x2fa   : > { %v878_v22 = vpop.permute.xlu1 %877  ;;  %v876_v23 = vpop.permute.xlu0 %875  ;;  %v902_v24 = vadd.f32 %v1672_v7, %v883_v21 }
 0x2fb   : > { %v880_v20 = vsel %vm771_vm8, %v876_v23, %v878_v22 }
 0x2fc   : > { %v884_v55 = vadd.f32 %v880_v20, %v840_v53 }
 0x2fe   : > { %v937_v25 = vpop.permute.xlu1 %936  ;;  %v935_v26 = vpop.permute.xlu0 %934  ;;  %v903_v28 = vadd.f32 %v1668_v5, %v884_v55 }
 0x2ff   : > { %v942_v35 = vsel %vm740_vm7, %v935_v26, %v937_v25 }
 0x300   : > { %v946_v30 = vadd.f32 %v942_v35, %v902_v24 }
 0x302   : > { %v941_v3 = vpop.permute.xlu1 %940  ;;  %v939_v47 = vpop.permute.xlu0 %938 }
 0x303   : > { %v943_v31 = vsel %vm740_vm7, %v939_v47, %v941_v3 }
 0x304   : > { %v947_v34 = vadd.f32 %v943_v31, %v903_v28 }
 0x306   : > { %v981_v29 = vpop.permute.xlu1 %980  ;;  %v979_v45 = vpop.permute.xlu0 %978 }
 0x307   : > { %v986_v32 = vsel %vm771_vm8, %v979_v45, %v981_v29 }
 0x308   : > { %v990_v7 = vadd.f32 %v986_v32, %v946_v30 }
 0x30a   : > { %v985_v36 = vpop.permute.xlu1 %984  ;;  %v983_v57 = vpop.permute.xlu0 %982  ;;  %v992_v37 = vmax.f32 %v990_v7, 0.0 }
 0x30b   : > { %v987_v38 = vsel %vm771_vm8, %v983_v57, %v985_v36 }
 0x30c   : > { %v991_v5 = vadd.f32 %v987_v38, %v947_v34  ;;  %1249 = vmatprep.mubr.f32.mxu1 %v992_v37 }
 0x30e   : > { %v993_v27 = vmax.f32 %v991_v5, 0.0 }
 0x310   : > { %1250 = vmatmul.mubr.f32.vlgmr.msra.gmra.mrb[0].mxu1 %v993_v27 }
 0x3e3   : > { %v1251_v39 = vpop.f32.mrb[0].mxu1 }
 0x3e4   : > { %v1089_v40 = vadd.f32 %v1251_v39, %v1165_v56  ;;  %v1083_v41 = vpop.f32.mrb[1].mxu1 }
 0x3e5   : > { %v1084_v43 = vadd.f32 %v1165_v56, %v1083_v41 }
 0x3e6   : > { %v1093_v42 = vmax.f32 %v1089_v40, 0.0 }
 0x3e7   : > { %v1092_v44 = vmax.f32 %v1084_v43, 0.0 }
 0x3e8   : > { %1095 = vst [vmem:[%s332_s23 + $0x8] sm:$0xff] %v1093_v42 }
 0x3e9   : > { %1094 = vst [vmem:[%s332_s23] sm:$0xff] %v1092_v44 }
 0x3ea PF: > { %s19_s30 = sadd.s32 1, %s1320_s30  }
 0x3eb   : > { %p16_p4 = scmp.ge.s32.totalorder %s19_s30, 4  }
 0x3ed   :  { %18 = sbr.rel (!%p16_p4) target bundleno = 1 (0x1), region = 86 }

</bundles_post_ra>
